<compile_context>
chip_gen: v7x
topology: tpu7x:2x2x1
jax: 0.10.0
libtpu: 0.0.40
codegen_flags: <defaults>
</compile_context>

<pallas_src>
import functools

import jax
import jax.numpy as jnp
from jax.experimental import pallas as pl
from jax.experimental.pallas import tpu as pltpu

IN_FEATURES = 784
H1 = 256
H2 = 64


def discriminator_kernel(x_ref, w1_ref, b1_ref, w2_ref, b2_ref, w3_ref, b3_ref, o_ref):
    # Cast the f32 input tile to bf16 in VMEM (cheap VPU op, hidden under the
    # fc1 MXU time).
    x = x_ref[...].astype(jnp.bfloat16)

    # fc1 + relu: bf16 MXU matmul, f32 accumulation + f32 epilogue.
    h1 = jnp.dot(x, w1_ref[...], preferred_element_type=jnp.float32)
    h1 = jnp.maximum(h1 + b1_ref[...], 0.0)

    # fc2 + relu.
    h2 = jnp.dot(h1.astype(jnp.bfloat16), w2_ref[...],
                 preferred_element_type=jnp.float32)
    h2 = jnp.maximum(h2 + b2_ref[...], 0.0)

    # fc3 (out_features == 1): VPU multiply + lane reduction instead of a
    # 1-lane-wide MXU matmul.
    z = jnp.sum(h2 * w3_ref[...], axis=-1, keepdims=True) + b3_ref[...]

    # Numerically stable sigmoid on the f32 logits.
    ez = jnp.exp(-jnp.abs(z))            # EUP
    p = 1.0 / (1.0 + ez)                 # sigmoid(|z|)
    o_ref[...] = jnp.where(z >= 0.0, p, 1.0 - p)


def prepare_params(w1, b1, w2, b2, w3, b3):
    """One-time prep: bf16 weights for the MXU, (1, out) f32 biases, w3 as an f32 row."""
    return (w1.astype(jnp.bfloat16),                      # (784, 256) bf16
            b1.reshape(1, H1).astype(jnp.float32),        # (1, 256)   f32
            w2.astype(jnp.bfloat16),                      # (256, 64)  bf16
            b2.reshape(1, H2).astype(jnp.float32),        # (1, 64)    f32
            w3.reshape(1, H2).astype(jnp.float32),        # (1, 64)    f32 row
            b3.reshape(1, 1).astype(jnp.float32))         # (1, 1)     f32


def _choose_tile(batch, tile_cap):
    # Balanced batch tiles: multiple of 8, total padding < 8 * n_tiles rows.
    # Keeps v7x's two cores evenly loaded and avoids wasting DMA/MXU work.
    n_tiles = max(1, (batch + tile_cap - 1) // tile_cap)
    per = (batch + n_tiles - 1) // n_tiles
    tile = ((per + 7) // 8) * 8
    n_tiles = (batch + tile - 1) // tile
    return tile, n_tiles


@functools.partial(jax.jit, static_argnames=("tile_b",))
def discriminator(x, w1, b1, w2, b2, w3, b3, *, tile_b=1024):
    """x: (B, 784) f32, params from prepare_params() -> (B, 1) f32."""
    B = x.shape[0]
    tile, n_tiles = _choose_tile(B, tile_b)

    return pl.pallas_call(
        discriminator_kernel,
        out_shape=jax.ShapeDtypeStruct((B, 1), jnp.float32),
        grid=(n_tiles,),
        in_specs=[
            pl.BlockSpec((tile, IN_FEATURES), lambda i: (i, 0)),  # x tile (pipelined; partial edge block OK)
            pl.BlockSpec((IN_FEATURES, H1), lambda i: (0, 0)),    # w1 (VMEM-resident)
            pl.BlockSpec((1, H1), lambda i: (0, 0)),              # b1
            pl.BlockSpec((H1, H2), lambda i: (0, 0)),             # w2
            pl.BlockSpec((1, H2), lambda i: (0, 0)),              # b2
            pl.BlockSpec((1, H2), lambda i: (0, 0)),              # w3 row
            pl.BlockSpec((1, 1), lambda i: (0, 0)),               # b3
        ],
        out_specs=pl.BlockSpec((tile, 1), lambda i: (i, 0)),
        compiler_params=pltpu.CompilerParams(
            dimension_semantics=("parallel",)),
    )(x, w1, b1, w2, b2, w3, b3)


def init_params(key):
    # nn.Linear-style init (uniform +/- 1/sqrt(fan_in)); weights stored as
    # (in_features, out_features) so the kernel computes x @ W + b.
    def lin(kw, kb, fan_in, fan_out):
        bound = 1.0 / float(fan_in) ** 0.5
        w = jax.random.uniform(kw, (fan_in, fan_out), jnp.float32, -bound, bound)
        b = jax.random.uniform(kb, (fan_out,), jnp.float32, -bound, bound)
        return w, b

    k = jax.random.split(key, 6)
    w1, b1 = lin(k[0], k[1], IN_FEATURES, H1)
    w2, b2 = lin(k[2], k[3], H1, H2)
    w3, b3 = lin(k[4], k[5], H2, 1)
    return w1, b1, w2, b2, w3, b3


def reference(x, w1, b1, w2, b2, w3, b3):
    h1 = jax.nn.relu(x @ w1 + b1)
    h2 = jax.nn.relu(h1 @ w2 + b2)
    return jax.nn.sigmoid(h2 @ w3 + b3)


if __name__ == "__main__":
    key = jax.random.PRNGKey(0)
    kx, kp = jax.random.split(key)
    raw = init_params(kp)
    params = prepare_params(*raw)          # one-time bf16/reshape prep (outside the call path)

    # Small-batch (latency) case: single exact tile.
    B = 8
    x = jax.random.normal(kx, (B, IN_FEATURES), jnp.float32)
    out = jax.block_until_ready(discriminator(x, *params))
    ref = reference(x, *raw)
    assert out.shape == (B, 1)
    assert jnp.allclose(out, ref, atol=2e-2), float(jnp.max(jnp.abs(out - ref)))

    # Ragged batch exercising the multi-tile grid + partial edge block path
    # (B=600, tile_b=512 -> two balanced tiles of 304 rows, last one partial).
    B2 = 600
    x2 = jax.random.normal(jax.random.fold_in(kx, 1), (B2, IN_FEATURES), jnp.float32)
    out2 = jax.block_until_ready(discriminator(x2, *params, tile_b=512))
    ref2 = reference(x2, *raw)
    assert out2.shape == (B2, 1)
    assert jnp.allclose(out2, ref2, atol=2e-2), float(jnp.max(jnp.abs(out2 - ref2)))

    print("KERNEL_OK")
</pallas_src>

<mosaic_0001>
module attributes {stable_mosaic.version = 11 : i64} {
  func.func @discriminator_kernel(%arg0: i32, %arg1: memref<8x784xf32, #tpu.memory_space<vmem>>, %arg2: memref<784x256xbf16, #tpu.memory_space<vmem>>, %arg3: memref<1x256xf32, #tpu.memory_space<vmem>>, %arg4: memref<256x64xbf16, #tpu.memory_space<vmem>>, %arg5: memref<1x64xf32, #tpu.memory_space<vmem>>, %arg6: memref<1x64xf32, #tpu.memory_space<vmem>>, %arg7: memref<1x1xf32, #tpu.memory_space<vmem>>, %arg8: memref<8x1xf32, #tpu.memory_space<vmem>>) attributes {dimension_semantics = [#tpu.dimension_semantics<parallel>], iteration_bounds = array<i64: 1>, scalar_prefetch = 0 : i64, scratch_operands = 0 : i64, tpu.core_type = #tpu.core_type<tc>, window_params = [{transform_indices = @transform_0, window_bounds = array<i64: 8, 784>}, {pipeline_mode = #tpu.pipeline_mode<synchronous>, transform_indices = @transform_1, window_bounds = array<i64: 784, 256>}, {pipeline_mode = #tpu.pipeline_mode<synchronous>, transform_indices = @transform_2, window_bounds = array<i64: 1, 256>}, {pipeline_mode = #tpu.pipeline_mode<synchronous>, transform_indices = @transform_3, window_bounds = array<i64: 256, 64>}, {pipeline_mode = #tpu.pipeline_mode<synchronous>, transform_indices = @transform_4, window_bounds = array<i64: 1, 64>}, {pipeline_mode = #tpu.pipeline_mode<synchronous>, transform_indices = @transform_5, window_bounds = array<i64: 1, 64>}, {pipeline_mode = #tpu.pipeline_mode<synchronous>, transform_indices = @transform_6, window_bounds = array<i64: 1, 1>}, {transform_indices = @transform_7, window_bounds = array<i64: 8, 1>}]} {
    %c0 = arith.constant 0 : index
    %c0_0 = arith.constant 0 : index
    %0 = vector.load %arg1[%c0, %c0_0] : memref<8x784xf32, #tpu.memory_space<vmem>>, vector<8x784xf32>
    %1 = arith.truncf %0 : vector<8x784xf32> to vector<8x784xbf16>
    %c0_1 = arith.constant 0 : index
    %c0_2 = arith.constant 0 : index
    %2 = vector.load %arg2[%c0_1, %c0_2] : memref<784x256xbf16, #tpu.memory_space<vmem>>, vector<784x256xbf16>
    %cst = arith.constant dense<0.000000e+00> : vector<8x256xf32>
    %3 = tpu.matmul %1, %2, %cst {dimension_numbers = #tpu.dot_dimension_numbers<[1], [0], [0], [1], [0, 0, 1, 1], [], []>} : vector<8x784xbf16>, vector<784x256xbf16>, vector<8x256xf32> -> vector<8x256xf32>
    %c0_3 = arith.constant 0 : index
    %c0_4 = arith.constant 0 : index
    %4 = vector.load %arg3[%c0_3, %c0_4] : memref<1x256xf32, #tpu.memory_space<vmem>>, vector<1x256xf32>
    %5 = vector.broadcast %4 : vector<1x256xf32> to vector<8x256xf32>
    %6 = arith.addf %3, %5 : vector<8x256xf32>
    %cst_5 = arith.constant 0.000000e+00 : f32
    %7 = vector.broadcast %cst_5 : f32 to vector<8x256xf32>
    %8 = arith.maximumf %6, %7 : vector<8x256xf32>
    %9 = arith.truncf %8 : vector<8x256xf32> to vector<8x256xbf16>
    %c0_6 = arith.constant 0 : index
    %c0_7 = arith.constant 0 : index
    %10 = vector.load %arg4[%c0_6, %c0_7] : memref<256x64xbf16, #tpu.memory_space<vmem>>, vector<256x64xbf16>
    %cst_8 = arith.constant dense<0.000000e+00> : vector<8x64xf32>
    %11 = tpu.matmul %9, %10, %cst_8 {dimension_numbers = #tpu.dot_dimension_numbers<[1], [0], [0], [1], [0, 0, 1, 1], [], []>} : vector<8x256xbf16>, vector<256x64xbf16>, vector<8x64xf32> -> vector<8x64xf32>
    %c0_9 = arith.constant 0 : index
    %c0_10 = arith.constant 0 : index
    %12 = vector.load %arg5[%c0_9, %c0_10] : memref<1x64xf32, #tpu.memory_space<vmem>>, vector<1x64xf32>
    %13 = vector.broadcast %12 : vector<1x64xf32> to vector<8x64xf32>
    %14 = arith.addf %11, %13 : vector<8x64xf32>
    %cst_11 = arith.constant 0.000000e+00 : f32
    %15 = vector.broadcast %cst_11 : f32 to vector<8x64xf32>
    %16 = arith.maximumf %14, %15 : vector<8x64xf32>
    %c0_12 = arith.constant 0 : index
    %c0_13 = arith.constant 0 : index
    %17 = vector.load %arg6[%c0_12, %c0_13] : memref<1x64xf32, #tpu.memory_space<vmem>>, vector<1x64xf32>
    %18 = vector.broadcast %17 : vector<1x64xf32> to vector<8x64xf32>
    %19 = arith.mulf %16, %18 : vector<8x64xf32>
    %cst_14 = arith.constant dense<0.000000e+00> : vector<8xf32>
    %20 = vector.multi_reduction <add>, %19, %cst_14 [1] : vector<8x64xf32> to vector<8xf32>
    %21 = vector.shape_cast %20 : vector<8xf32> to vector<8x1xf32>
    %c0_15 = arith.constant 0 : index
    %c0_16 = arith.constant 0 : index
    %22 = vector.load %arg7[%c0_15, %c0_16] : memref<1x1xf32, #tpu.memory_space<vmem>>, vector<1x1xf32>
    %23 = vector.broadcast %22 : vector<1x1xf32> to vector<8x1xf32>
    %24 = arith.addf %21, %23 : vector<8x1xf32>
    %25 = math.absf %24 : vector<8x1xf32>
    %cst_17 = arith.constant 0.000000e+00 : f32
    %26 = vector.broadcast %cst_17 : f32 to vector<8x1xf32>
    %27 = arith.subf %26, %25 : vector<8x1xf32>
    %28 = math.exp %27 : vector<8x1xf32>
    %cst_18 = arith.constant 1.000000e+00 : f32
    %29 = vector.broadcast %cst_18 : f32 to vector<8x1xf32>
    %30 = arith.addf %29, %28 : vector<8x1xf32>
    %cst_19 = arith.constant 1.000000e+00 : f32
    %31 = vector.broadcast %cst_19 : f32 to vector<8x1xf32>
    %32 = arith.divf %31, %30 : vector<8x1xf32>
    %cst_20 = arith.constant 0.000000e+00 : f32
    %33 = vector.broadcast %cst_20 : f32 to vector<8x1xf32>
    %34 = arith.cmpf oge, %24, %33 : vector<8x1xf32>
    %cst_21 = arith.constant 1.000000e+00 : f32
    %35 = vector.broadcast %cst_21 : f32 to vector<8x1xf32>
    %36 = arith.subf %35, %32 : vector<8x1xf32>
    %37 = arith.select %34, %32, %36 : vector<8x1xi1>, vector<8x1xf32>
    %c0_22 = arith.constant 0 : index
    %c0_23 = arith.constant 0 : index
    %38 = vector.load %arg8[%c0_22, %c0_23] : memref<8x1xf32, #tpu.memory_space<vmem>>, vector<8x1xf32>
    tpu.vector_store %arg8[%c0_22, %c0_23], %37 {strides = array<i32>} : memref<8x1xf32, #tpu.memory_space<vmem>>, vector<8x1xf32>,
    return
  }
  func.func @transform_0(%arg0: i32) -> (i32, i32) {
    %c0_i32 = arith.constant 0 : i32
    %c0_i32_0 = arith.constant 0 : i32
    return %arg0, %c0_i32 : i32, i32
  }
  func.func @transform_1(%arg0: i32) -> (i32, i32) {
    %c0_i32 = arith.constant 0 : i32
    %c0_i32_0 = arith.constant 0 : i32
    %c0_i32_1 = arith.constant 0 : i32
    return %c0_i32, %c0_i32_0 : i32, i32
  }
  func.func @transform_2(%arg0: i32) -> (i32, i32) {
    %c0_i32 = arith.constant 0 : i32
    %c0_i32_0 = arith.constant 0 : i32
    %c0_i32_1 = arith.constant 0 : i32
    return %c0_i32, %c0_i32_0 : i32, i32
  }
  func.func @transform_3(%arg0: i32) -> (i32, i32) {
    %c0_i32 = arith.constant 0 : i32
    %c0_i32_0 = arith.constant 0 : i32
    %c0_i32_1 = arith.constant 0 : i32
    return %c0_i32, %c0_i32_0 : i32, i32
  }
  func.func @transform_4(%arg0: i32) -> (i32, i32) {
    %c0_i32 = arith.constant 0 : i32
    %c0_i32_0 = arith.constant 0 : i32
    %c0_i32_1 = arith.constant 0 : i32
    return %c0_i32, %c0_i32_0 : i32, i32
  }
  func.func @transform_5(%arg0: i32) -> (i32, i32) {
    %c0_i32 = arith.constant 0 : i32
    %c0_i32_0 = arith.constant 0 : i32
    %c0_i32_1 = arith.constant 0 : i32
    return %c0_i32, %c0_i32_0 : i32, i32
  }
  func.func @transform_6(%arg0: i32) -> (i32, i32) {
    %c0_i32 = arith.constant 0 : i32
    %c0_i32_0 = arith.constant 0 : i32
    %c0_i32_1 = arith.constant 0 : i32
    return %c0_i32, %c0_i32_0 : i32, i32
  }
  func.func @transform_7(%arg0: i32) -> (i32, i32) {
    %c0_i32 = arith.constant 0 : i32
    %c0_i32_0 = arith.constant 0 : i32
    return %arg0, %c0_i32 : i32, i32
  }
}

</mosaic_0001>

<bundles_post_ra>
// kernel: discriminator.1
= control target key start
LH: loop header
LB: loop body
LE: loop exit
PB: predicated region body
PF: predicated region fallthrough
CT: control target
= control target key end

     0   :  { %s1527_s0 = inlined_call_operand.vmem [shape: f32[8,784], index: 0, kind: input, shape index: {}]   ;;  %s1528_s1 = inlined_call_operand.hbm [shape: bf16[784,256], index: 1, kind: input, shape index: {}]   ;;  %s1529_s2 = inlined_call_operand.vmem [shape: f32[1,256], index: 2, kind: input, shape index: {}]   ;;  %s1530_s3 = inlined_call_operand.vmem [shape: bf16[256,64], index: 3, kind: input, shape index: {}]   ;;  %s1531_s4 = inlined_call_operand.vmem [shape: f32[1,64], index: 4, kind: input, shape index: {}]   ;;  %s1532_s5 = inlined_call_operand.vmem [shape: f32[1,64], index: 5, kind: input, shape index: {}]   ;;  %s1533_s6 = inlined_call_operand.<no memory space> [shape: f32[1,1], index: 6, kind: input, shape index: {}]   ;;  %s1534_s7 = inlined_call_operand.vmem [shape: f32[8,1], index: 7, kind: output, shape index: {}]  }
   0x1   :  { %v12_v0 = vstv %s1533_s6 }
   0x2   :  { %13 = vst [vmem:[#allocation2] sm:$0x1] %v12_v0 }
   0x3   :  { %14 = vsyncpa [#allocation4], 0  ;;  %s1387_s26 = smov [#allocation3]   ;;  %s1363_s30 = scalar_lea.hbm %s1528_s1, 12544 }
   0x4   :  { %s22_s27 = sshll.u32 %s1387_s26, 4  ;;  %p1364_p0 = scmp.ne.s32.totalorder %s1528_s1, %s1363_s30  ;;  %s23_s27 = int_to_ptr.vmem [resolvable:$true] %s22_s27 }
   0x5   :  { %p1367_p1 = scmp.lt.u32.totalorder %s1363_s30, %s1528_s1 }
   0x7   :  { %p1369_p2 = pnand %p1367_p1, %p1364_p0 }
   0x9   :  { %1372 = shalt.err (!%p1369_p2)
}
   0xa   :  { %s1373_s6 = scalar_lea.vmem %s23_s27, 12544  ;;  %p1378_p4 = scmp.lt.s32.totalorder %s23_s27, %s23_s27 }
   0xb   :  { %p1374_p3 = scmp.ne.s32.totalorder %s23_s27, %s1373_s6  ;;  %p1379_p5 = scmp.lt.s32.totalorder %s1373_s6, %s1373_s6 }
   0xd   :  { %p1380_p6 = por %p1379_p5, %p1378_p4 }
   0xf   :  { %p1381_p7 = pnand %p1380_p6, %p1374_p3 }
  0x11   :  { %1384 = shalt.err (!%p1381_p7)
}
  0x12   :  { %s1388_s12 = smov 128   ;;  %s1389_s13 = smov 8  }
  0x13   :  { %28 = dma.hbm_to_vmem [thread:$0]  %s1528_s1, 12544, %s23_s27, [#allocation4], %s1388_s12, %s1388_s12, %s1389_s13  }
  0x14   :  { %1385 = dma.done.wait [#allocation4], 12544  }
  0x15   :  { %1386 = vsyncadd [#allocation4], 4294954752  ;;  %v1196_v1 = vld [vmem:[#allocation3 + $0x104] ss:$8 sps:$4 sm:$0xff]   ;;  %v1198_v2 = vld [vmem:[#allocation3 + $0x100] ss:$8 sps:$4 sm:$0xff]  }
  0x16   :  { %702 = vmatprep.subr.bf16.mxu0 %v1196_v1  ;;  %v1199_v3 = vld [vmem:[#allocation3 + $0x114] ss:$8 sps:$4 sm:$0xff]   ;;  %v1201_v4 = vld [vmem:[#allocation3 + $0x110] ss:$8 sps:$4 sm:$0xff]   ;;  %v1202_v5 = vld [vmem:[#allocation3 + $0x124] ss:$8 sps:$4 sm:$0xff]  }
  0x17   :  { %703 = vmatpush1.bf16.msra.mxu0 %v1198_v2  ;;  %v1204_v6 = vld [vmem:[#allocation3 + $0x120] ss:$8 sps:$4 sm:$0xff]   ;;  %v1205_v7 = vld [vmem:[#allocation3 + $0x134] ss:$8 sps:$4 sm:$0xff]   ;;  %v1207_v8 = vld [vmem:[#allocation3 + $0x130] ss:$8 sps:$4 sm:$0xff]  }
  0x18   :  { %704 = vmatprep.subr.bf16.mxu0 %v1199_v3  ;;  %v1208_v9 = vld [vmem:[#allocation3 + $0x144] ss:$8 sps:$4 sm:$0xff]   ;;  %v1210_v10 = vld [vmem:[#allocation3 + $0x140] ss:$8 sps:$4 sm:$0xff]   ;;  %v1211_v11 = vld [vmem:[#allocation3 + $0x154] ss:$8 sps:$4 sm:$0xff]  }
  0x19   :  { %v1213_v12 = vld [vmem:[#allocation3 + $0x150] ss:$8 sps:$4 sm:$0xff]   ;;  %v1238_v13 = vld [vmem:[#allocation3 + $0x4] ss:$8 sps:$4 sm:$0xff]   ;;  %v1240_v14 = vld [vmem:[#allocation3] ss:$8 sps:$4 sm:$0xff]  }
  0x1a   :  { %v1214_v15 = vld [vmem:[#allocation3 + $0x164] ss:$8 sps:$4 sm:$0xff]   ;;  %661 = vmatprep.subr.bf16.mxu1 %v1238_v13  ;;  %v1244_v16 = vld [vmem:[#allocation3 + $0x14] ss:$8 sps:$4 sm:$0xff]   ;;  %v1246_v17 = vld [vmem:[#allocation3 + $0x10] ss:$8 sps:$4 sm:$0xff]  }
  0x1b   :  { %705 = vmatpush1.bf16.msra.mxu0 %v1201_v4  ;;  %662 = vmatpush1.bf16.msra.mxu1 %v1240_v14  ;;  %v1216_v18 = vld [vmem:[#allocation3 + $0x160] ss:$8 sps:$4 sm:$0xff]   ;;  %v1217_v19 = vld [vmem:[#allocation3 + $0x174] ss:$8 sps:$4 sm:$0xff]   ;;  %v1250_v20 = vld [vmem:[#allocation3 + $0x24] ss:$8 sps:$4 sm:$0xff]  }
  0x1c   :  { %706 = vmatprep.subr.bf16.mxu0 %v1202_v5  ;;  %663 = vmatprep.subr.bf16.mxu1 %v1244_v16  ;;  %v46_v21 = vld [vmem:[%s1527_s0 + $0x18] sm:$0xff]  ;;  %v1252_v22 = vld [vmem:[#allocation3 + $0x20] ss:$8 sps:$4 sm:$0xff]   ;;  %v1220_v25 = vld [vmem:[#allocation3 + $0x184] ss:$8 sps:$4 sm:$0xff]   ;;  %vm657_vm0 = vcmask 130048  }
  0x1d   :  { %v53_v23 = vpack.c.bf16 %v46_v21, %v46_v21  ;;  %v1219_v24 = vld [vmem:[#allocation3 + $0x170] ss:$8 sps:$4 sm:$0xff]   ;;  %v1256_v26 = vld [vmem:[#allocation3 + $0x34] ss:$8 sps:$4 sm:$0xff]   ;;  %v1222_v27 = vld [vmem:[#allocation3 + $0x180] ss:$8 sps:$4 sm:$0xff]  }
  0x1e   :  { %v1258_v28 = vld [vmem:[#allocation3 + $0x30] ss:$8 sps:$4 sm:$0xff]   ;;  %v1262_v29 = vld [vmem:[#allocation3 + $0x44] ss:$8 sps:$4 sm:$0xff]   ;;  %v1223_v30 = vld [vmem:[#allocation3 + $0x194] ss:$8 sps:$4 sm:$0xff]  }
  0x1f   :  { %707 = vmatpush1.bf16.msra.mxu0 %v1204_v6  ;;  %664 = vmatpush1.bf16.msra.mxu1 %v1246_v17  ;;  %v1225_v31 = vld [vmem:[#allocation3 + $0x190] ss:$8 sps:$4 sm:$0xff]   ;;  %v1264_v32 = vld [vmem:[#allocation3 + $0x40] ss:$8 sps:$4 sm:$0xff]   ;;  %v1268_v33 = vld [vmem:[#allocation3 + $0x54] ss:$8 sps:$4 sm:$0xff]  }
  0x20   :  { %708 = vmatprep.subr.bf16.mxu0 %v1205_v7  ;;  %665 = vmatprep.subr.bf16.mxu1 %v1250_v20  ;;  %v1226_v34 = vld [vmem:[#allocation3 + $0x1a4] ss:$8 sps:$4 sm:$0xff]   ;;  %v1228_v35 = vld [vmem:[#allocation3 + $0x1a0] ss:$8 sps:$4 sm:$0xff]   ;;  %v1270_v36 = vld [vmem:[#allocation3 + $0x50] ss:$8 sps:$4 sm:$0xff]  }
  0x21   :  { %734 = vmatprep.mubr.bf16.mxu0 %v53_v23  ;;  %v1274_v37 = vld [vmem:[#allocation3 + $0x64] ss:$8 sps:$4 sm:$0xff]   ;;  %v1229_v38 = vld [vmem:[#allocation3 + $0x1b4] ss:$8 sps:$4 sm:$0xff]   ;;  %v1231_v39 = vld [vmem:[#allocation3 + $0x1b0] ss:$8 sps:$4 sm:$0xff]  }
  0x22   :  { %v1276_v40 = vld [vmem:[#allocation3 + $0x60] ss:$8 sps:$4 sm:$0xff]   ;;  %v1280_v41 = vld [vmem:[#allocation3 + $0x74] ss:$8 sps:$4 sm:$0xff]   ;;  %v1232_v42 = vld [vmem:[#allocation3 + $0x1c4] ss:$8 sps:$4 sm:$0xff]  }
  0x23   :  { %709 = vmatpush1.bf16.msra.mxu0 %v1207_v8  ;;  %666 = vmatpush1.bf16.msra.mxu1 %v1252_v22  ;;  %v1234_v43 = vld [vmem:[#allocation3 + $0x1c0] ss:$8 sps:$4 sm:$0xff]   ;;  %v1282_v44 = vld [vmem:[#allocation3 + $0x70] ss:$8 sps:$4 sm:$0xff]   ;;  %v1286_v45 = vld [vmem:[#allocation3 + $0x84] ss:$8 sps:$4 sm:$0xff]  }
  0x24   :  { %710 = vmatprep.subr.bf16.mxu0 %v1208_v9  ;;  %667 = vmatprep.subr.bf16.mxu1 %v1256_v26  ;;  %v1235_v46 = vld [vmem:[#allocation3 + $0x1d4] ss:$8 sps:$4 sm:$0xff]   ;;  %v1237_v47 = vld [vmem:[#allocation3 + $0x1d0] ss:$8 sps:$4 sm:$0xff]   ;;  %v1288_v48 = vld [vmem:[#allocation3 + $0x80] ss:$8 sps:$4 sm:$0xff]  }
  0x25   :  { %v1292_v49 = vld [vmem:[#allocation3 + $0x94] ss:$8 sps:$4 sm:$0xff]   ;;  %v1241_v50 = vld [vmem:[#allocation3 + $0x1e4] ss:$8 sps:$4 sm:$0xff]   ;;  %v1243_v51 = vld [vmem:[#allocation3 + $0x1e0] ss:$8 sps:$4 sm:$0xff]  }
  0x26   :  { %v1294_v52 = vld [vmem:[#allocation3 + $0x90] ss:$8 sps:$4 sm:$0xff]   ;;  %v1298_v53 = vld [vmem:[#allocation3 + $0xa4] ss:$8 sps:$4 sm:$0xff]   ;;  %v1247_v54 = vld [vmem:[#allocation3 + $0x1f4] ss:$8 sps:$4 sm:$0xff]  }
  0x27   :  { %711 = vmatpush1.bf16.msra.mxu0 %v1210_v10  ;;  %668 = vmatpush1.bf16.msra.mxu1 %v1258_v28  ;;  %v1249_v55 = vld [vmem:[#allocation3 + $0x1f0] ss:$8 sps:$4 sm:$0xff]   ;;  %v1300_v57 = vld [vmem:[#allocation3 + $0xa0] ss:$8 sps:$4 sm:$0xff]   ;;  %v1304_v58 = vld [vmem:[#allocation3 + $0xb4] ss:$8 sps:$4 sm:$0xff]  }
  0x28   :  { %712 = vmatprep.subr.bf16.mxu0 %v1211_v11  ;;  %669 = vmatprep.subr.bf16.mxu1 %v1262_v29  ;;  %v45_v56 = vld [vmem:[%s1527_s0 + $0x10] sm:$0xff]  ;;  %v44_v62 = vld [vmem:[%s1527_s0 + $0x8] sm:$0xff]  ;;  %vm1013_vm1 = vcmask 523264   ;;  %vm1035_vm2 = vcmask 7168  }
  0x29   :  { %v1255_v59 = vld [vmem:[#allocation3 + $0x204] ss:$8 sps:$4 sm:$0xff]   ;;  %v52_v60 = vpack.c.bf16 %v45_v56, %v45_v56  ;;  %v1306_v61 = vld [vmem:[#allocation3 + $0xb0] ss:$8 sps:$4 sm:$0xff]   ;;  %v1253_v63 = vld [vmem:[#allocation3 + $0x200] ss:$8 sps:$4 sm:$0xff]   ;;  %v51_v1 = vpack.c.bf16 %v44_v62, %v44_v62 }
  0x2a   :  { %v1310_v0 = vld [vmem:[#allocation3 + $0xc4] ss:$8 sps:$4 sm:$0xff]   ;;  %v1261_v2 = vld [vmem:[#allocation3 + $0x214] ss:$8 sps:$4 sm:$0xff]   ;;  %v1312_v3 = vld [vmem:[#allocation3 + $0xc0] ss:$8 sps:$4 sm:$0xff]  }
  0x2b   :  { %713 = vmatpush1.bf16.msra.mxu0 %v1213_v12  ;;  %670 = vmatpush1.bf16.msra.mxu1 %v1264_v32  ;;  %v48_v4 = vld [vmem:[%s1527_s0 + $0x28] sm:$0xff]  ;;  %v1259_v5 = vld [vmem:[#allocation3 + $0x210] ss:$8 sps:$4 sm:$0xff]   ;;  %v1316_v6 = vld [vmem:[#allocation3 + $0xd4] ss:$8 sps:$4 sm:$0xff]  }
  0x2c   :  { %714 = vmatprep.subr.bf16.mxu0 %v1214_v15  ;;  %671 = vmatprep.subr.bf16.mxu1 %v1268_v33  ;;  %v55_v7 = vpack.c.bf16 %v48_v4, %v48_v4  ;;  %v1267_v8 = vld [vmem:[#allocation3 + $0x224] ss:$8 sps:$4 sm:$0xff]   ;;  %v1265_v9 = vld [vmem:[#allocation3 + $0x220] ss:$8 sps:$4 sm:$0xff]   ;;  %v1318_v10 = vld [vmem:[#allocation3 + $0xd0] ss:$8 sps:$4 sm:$0xff]  }
  0x2d   :  { %693 = vmatprep.mubr.bf16.mxu1 %v51_v1  ;;  %v1322_v11 = vld [vmem:[#allocation3 + $0xe4] ss:$8 sps:$4 sm:$0xff]   ;;  %v1273_v12 = vld [vmem:[#allocation3 + $0x234] ss:$8 sps:$4 sm:$0xff]   ;;  %v1271_v13 = vld [vmem:[#allocation3 + $0x230] ss:$8 sps:$4 sm:$0xff]  }
  0x2e   :  { %v1324_v14 = vld [vmem:[#allocation3 + $0xe0] ss:$8 sps:$4 sm:$0xff]   ;;  %v1328_v15 = vld [vmem:[#allocation3 + $0xf4] ss:$8 sps:$4 sm:$0xff]   ;;  %v1279_v16 = vld [vmem:[#allocation3 + $0x244] ss:$8 sps:$4 sm:$0xff]  }
  0x2f   :  { %715 = vmatpush1.bf16.msra.mxu0 %v1216_v18  ;;  %672 = vmatpush1.bf16.msra.mxu1 %v1270_v36  ;;  %v1330_v17 = vld [vmem:[#allocation3 + $0xf0] ss:$8 sps:$4 sm:$0xff]   ;;  %v43_v18 = vld [vmem:[%s1527_s0] sm:$0xff]  ;;  %v1346_v36 = vld [vmem:[%s1530_s3 + $0x8] sm:$0xff]  }
  0x30   :  { %716 = vmatprep.subr.bf16.mxu0 %v1217_v19  ;;  %673 = vmatprep.subr.bf16.mxu1 %v1274_v37  ;;  %v1277_v19 = vld [vmem:[#allocation3 + $0x240] ss:$8 sps:$4 sm:$0xff]   ;;  %v1339_v20 = vld [vmem:[#allocation3 + $0x304] ss:$8 sps:$4 sm:$0xff]   ;;  %v1285_v21 = vld [vmem:[#allocation3 + $0x254] ss:$8 sps:$4 sm:$0xff]   ;;  %v50_v22 = vpack.c.bf16 %v43_v18, %v43_v18 }
  0x31   :  { %v1337_v23 = vld [vmem:[#allocation3 + $0x300] ss:$8 sps:$4 sm:$0xff]   ;;  %v1291_v26 = vld [vmem:[#allocation3 + $0x264] ss:$8 sps:$4 sm:$0xff]   ;;  %v1295_v33 = vld [vmem:[#allocation3 + $0x270] ss:$8 sps:$4 sm:$0xff]  }
  0x32   :  { %v49_v28 = vld [vmem:[%s1527_s0 + $0x30] sm:$0xff]  ;;  %v1289_v29 = vld [vmem:[#allocation3 + $0x260] ss:$8 sps:$4 sm:$0xff]   ;;  %v1349_v56 = vld [vmem:[%s1530_s3 + $0x58] sm:$0xff]  }
  0x33   :  { %717 = vmatpush1.bf16.msra.mxu0 %v1219_v24  ;;  %674 = vmatpush1.bf16.msra.mxu1 %v1276_v40  ;;  %v1283_v24 = vld [vmem:[#allocation3 + $0x250] ss:$8 sps:$4 sm:$0xff]   ;;  %v1344_v32 = vld [vmem:[%s1530_s3] sm:$0xff]  }
  0x34   :  { %718 = vmatprep.subr.bf16.mxu0 %v1220_v25  ;;  %675 = vmatprep.subr.bf16.mxu1 %v1280_v41  ;;  %v1343_v25 = vld [vmem:[%s1530_s3 + $0x40] sm:$0xff]   ;;  %v1348_v40 = vld [vmem:[%s1530_s3 + $0x10] sm:$0xff]   ;;  %v1358_v1 = vld [vmem:[%s1530_s3 + $0x38] sm:$0xff]  }
  0x35   :  { %v1301_v37 = vld [vmem:[#allocation3 + $0x280] ss:$8 sps:$4 sm:$0xff]   ;;  %v1307_v41 = vld [vmem:[#allocation3 + $0x290] ss:$8 sps:$4 sm:$0xff]  }
  0x36   :  { %v1355_v62 = vld [vmem:[%s1530_s3 + $0x70] sm:$0xff]  }
  0x37   :  { %719 = vmatpush1.bf16.msra.mxu0 %v1222_v27  ;;  %676 = vmatpush1.bf16.msra.mxu1 %v1282_v44  ;;  %v1390_v27 = vmov 0   ;;  %v1321_v44 = vld [vmem:[#allocation3 + $0x2b4] ss:$8 sps:$4 sm:$0xff]  }
  0x38   :  { %720 = vmatprep.subr.bf16.mxu0 %v1223_v30  ;;  %677 = vmatprep.subr.bf16.mxu1 %v1286_v45  ;;  %v1297_v30 = vld [vmem:[#allocation3 + $0x274] ss:$8 sps:$4 sm:$0xff]   ;;  %v1319_v45 = vld [vmem:[#allocation3 + $0x2b0] ss:$8 sps:$4 sm:$0xff]  }
  0x3b   :  { %721 = vmatpush1.bf16.msra.mxu0 %v1225_v31  ;;  %678 = vmatpush1.bf16.msra.mxu1 %v1288_v48  ;;  %v56_v31 = vpack.c.bf16 %v49_v28, %v49_v28  ;;  %v1333_v48 = vld [vmem:[#allocation3 + $0x2d4] ss:$8 sps:$4 sm:$0xff]  }
  0x3c   :  { %722 = vmatprep.subr.bf16.mxu0 %v1226_v34  ;;  %679 = vmatprep.subr.bf16.mxu1 %v1292_v49  ;;  %v1345_v34 = vld [vmem:[%s1530_s3 + $0x48] sm:$0xff]   ;;  %v1331_v49 = vld [vmem:[#allocation3 + $0x2d0] ss:$8 sps:$4 sm:$0xff]  }
  0x3f   :  { %723 = vmatpush1.bf16.msra.mxu0 %v1228_v35  ;;  %680 = vmatpush1.bf16.msra.mxu1 %v1294_v52  ;;  %v1303_v35 = vld [vmem:[#allocation3 + $0x284] ss:$8 sps:$4 sm:$0xff]   ;;  %v1342_v52 = vld [vmem:[#allocation3 + $0x2f4] ss:$8 sps:$4 sm:$0xff]  }
  0x40   :  { %724 = vmatprep.subr.bf16.mxu0 %v1229_v38  ;;  %681 = vmatprep.subr.bf16.mxu1 %v1298_v53  ;;  %v1347_v38 = vld [vmem:[%s1530_s3 + $0x50] sm:$0xff]  }
  0x41   :  { %v1340_v53 = vld [vmem:[#allocation3 + $0x2f0] ss:$8 sps:$4 sm:$0xff]  }
  0x43   :  { %725 = vmatpush1.bf16.msra.mxu0 %v1231_v39  ;;  %682 = vmatpush1.bf16.msra.mxu1 %v1300_v57  ;;  %v1309_v39 = vld [vmem:[#allocation3 + $0x294] ss:$8 sps:$4 sm:$0xff]  }
  0x44   :  { %726 = vmatprep.subr.bf16.mxu0 %v1232_v42  ;;  %683 = vmatprep.subr.bf16.mxu1 %v1304_v58  ;;  %v1315_v42 = vld [vmem:[#allocation3 + $0x2a4] ss:$8 sps:$4 sm:$0xff]   ;;  %v1350_v57 = vld [vmem:[%s1530_s3 + $0x18] sm:$0xff]  }
  0x45   :  { %v1351_v58 = vld [vmem:[%s1530_s3 + $0x60] sm:$0xff]  }
  0x47   :  { %727 = vmatpush1.bf16.msra.mxu0 %v1234_v43  ;;  %684 = vmatpush1.bf16.msra.mxu1 %v1306_v61  ;;  %v1313_v43 = vld [vmem:[#allocation3 + $0x2a0] ss:$8 sps:$4 sm:$0xff]  }
  0x48   :  { %728 = vmatprep.subr.bf16.mxu0 %v1235_v46  ;;  %685 = vmatprep.subr.bf16.mxu1 %v1310_v0  ;;  %v1327_v46 = vld [vmem:[#allocation3 + $0x2c4] ss:$8 sps:$4 sm:$0xff]   ;;  %v1357_v0 = vld [vmem:[%s1530_s3 + $0x78] sm:$0xff]  }
  0x49   :  { %v1354_v61 = vld [vmem:[%s1530_s3 + $0x28] sm:$0xff]  }
  0x4b   :  { %729 = vmatpush1.bf16.msra.mxu0 %v1237_v47  ;;  %686 = vmatpush1.bf16.msra.mxu1 %v1312_v3  ;;  %v1325_v47 = vld [vmem:[#allocation3 + $0x2c0] ss:$8 sps:$4 sm:$0xff]  }
  0x4c   :  { %730 = vmatprep.subr.bf16.mxu0 %v1241_v50  ;;  %687 = vmatprep.subr.bf16.mxu1 %v1316_v6  ;;  %v1336_v50 = vld [vmem:[#allocation3 + $0x2e4] ss:$8 sps:$4 sm:$0xff]  }
  0x4f   :  { %731 = vmatpush1.bf16.msra.mxu0 %v1243_v51  ;;  %688 = vmatpush1.bf16.msra.mxu1 %v1318_v10  ;;  %v1334_v51 = vld [vmem:[#allocation3 + $0x2e0] ss:$8 sps:$4 sm:$0xff]   ;;  %v157_v10 = vlaneseq }
  0x50   :  { %732 = vmatprep.subr.bf16.mxu0 %v1247_v54  ;;  %689 = vmatprep.subr.bf16.mxu1 %v1322_v11  ;;  %v47_v54 = vld [vmem:[%s1527_s0 + $0x20] sm:$0xff] }
  0x51   :  { %v158_v11 = vshrl.u32 %v157_v10, 7 }
  0x53   :  { %733 = vmatpush1.bf16.msra.mxu0 %v1249_v55  ;;  %690 = vmatpush1.bf16.msra.mxu1 %v1324_v14  ;;  %v54_v55 = vpack.c.bf16 %v47_v54, %v47_v54  ;;  %v163_v14 = vsub.s32 1, %v158_v11 }
  0x54   :  { %743 = vmatprep.subr.bf16.mxu0 %v1255_v59  ;;  %691 = vmatprep.subr.bf16.mxu1 %v1328_v15  ;;  %v1352_v59 = vld [vmem:[%s1530_s3 + $0x20] sm:$0xff]  }
  0x56   :  { %735 = vmatmul.mubr.bf16.vlgmr.msra.gmra.mrb[0].mxu0 %v52_v60  ;;  %v1353_v60 = vld [vmem:[%s1530_s3 + $0x68] sm:$0xff]  }
  0x57   :  { %744 = vmatpush1.bf16.msra.mxu0 %v1253_v63  ;;  %775 = vmatprep.mubr.bf16.mxu0 %v55_v7  ;;  %v1356_v63 = vld [vmem:[%s1530_s3 + $0x30] sm:$0xff]  }
  0x58   :  { %745 = vmatprep.subr.bf16.mxu0 %v1261_v2  ;;  %692 = vmatpush1.bf16.msra.mxu1 %v1330_v17 }
  0x59   :  { %784 = vmatprep.subr.bf16.mxu1 %v1339_v20 }
  0x5b   :  { %746 = vmatpush1.bf16.msra.mxu0 %v1259_v5  ;;  %694 = vmatmul.mubr.bf16.vlgmr.msra.gmra.mrb[0].mxu1 %v50_v22 }
  0x5c   :  { %747 = vmatprep.subr.bf16.mxu0 %v1267_v8  ;;  %785 = vmatpush1.bf16.msra.mxu1 %v1337_v23 }
  0x5d   :  { %816 = vmatprep.mubr.bf16.mxu1 %v1390_v27  ;;  %1160 = vmatprep.subr.bf16.mxu1 %v1343_v25 }
  0x5f   :  { %748 = vmatpush1.bf16.msra.mxu0 %v1265_v9 }
  0x60   :  { %749 = vmatprep.subr.bf16.mxu0 %v1273_v12  ;;  %v159_v12 = vsub.s32 0, %v158_v11 }
  0x63   :  { %750 = vmatpush1.bf16.msra.mxu0 %v1271_v13  ;;  %1140 = vmatmul.mubr.msk.bf16.vlgmr.msra.gmra.mrb[4].mxu1 %vm657_vm0, %v56_v31  ;;  %v155_v13 = vld [vmem:[%s1529_s2] sm:$0x3] }
  0x64   :  { %751 = vmatprep.subr.bf16.mxu0 %v1279_v16  ;;  %1161 = vmatpush3.bf16.msra.mxu1 %v1344_v32  ;;  %v160_v15 = vrot.slane %v155_v13, %v159_v12  ;;  %v164_v16 = vrot.slane %v155_v13, %v163_v14  ;;  %v1141_v32 = vld [vmem:[%s1531_s4] ss:$0 sm:$0xff] }
  0x65   :  { %1162 = vmatprep.subr.bf16.mxu1 %v1345_v34 }
  0x67   :  { %752 = vmatpush1.bf16.msra.mxu0 %v1277_v19 }
  0x68   :  { %753 = vmatprep.subr.bf16.mxu0 %v1285_v21  ;;  %1163 = vmatpush3.bf16.msra.mxu1 %v1346_v36 }
  0x69   :  { %1164 = vmatprep.subr.bf16.mxu1 %v1347_v38  ;;  %v1158_v38 = vld [vmem:[%s1532_s5] ss:$0 sm:$0xff] }
  0x6b   :  { %754 = vmatpush1.bf16.msra.mxu0 %v1283_v24 }
  0x6c   :  { %755 = vmatprep.subr.bf16.mxu0 %v1291_v26  ;;  %1165 = vmatpush3.bf16.msra.mxu1 %v1348_v40 }
  0x6d   :  { %1166 = vmatprep.subr.bf16.mxu1 %v1349_v56 }
  0x6f   :  { %756 = vmatpush1.bf16.msra.mxu0 %v1289_v29 }
  0x70   :  { %757 = vmatprep.subr.bf16.mxu0 %v1297_v30  ;;  %1167 = vmatpush3.bf16.msra.mxu1 %v1350_v57 }
  0x71   :  { %1168 = vmatprep.subr.bf16.mxu1 %v1351_v58 }
  0x73   :  { %758 = vmatpush1.bf16.msra.mxu0 %v1295_v33 }
  0x74   :  { %759 = vmatprep.subr.bf16.mxu0 %v1303_v35  ;;  %1169 = vmatpush3.bf16.msra.mxu1 %v1352_v59 }
  0x75   :  { %1170 = vmatprep.subr.bf16.mxu1 %v1353_v60 }
  0x77   :  { %760 = vmatpush1.bf16.msra.mxu0 %v1301_v37 }
  0x78   :  { %761 = vmatprep.subr.bf16.mxu0 %v1309_v39  ;;  %1171 = vmatpush3.bf16.msra.mxu1 %v1354_v61 }
  0x79   :  { %1172 = vmatprep.subr.bf16.mxu1 %v1355_v62 }
  0x7b   :  { %762 = vmatpush1.bf16.msra.mxu0 %v1307_v41 }
  0x7c   :  { %763 = vmatprep.subr.bf16.mxu0 %v1315_v42  ;;  %1173 = vmatpush3.bf16.msra.mxu1 %v1356_v63  ;;  %v1159_v42 = vld [vmem:[#allocation2] ss:$0 sm:$0xff] }
  0x7d   :  { %1174 = vmatprep.subr.bf16.mxu1 %v1357_v0 }
  0x7f   :  { %764 = vmatpush1.bf16.msra.mxu0 %v1313_v43 }
  0x80   :  { %765 = vmatprep.subr.bf16.mxu0 %v1321_v44  ;;  %1175 = vmatpush3.bf16.msra.mxu1 %v1358_v1 }
  0x83   :  { %766 = vmatpush1.bf16.msra.mxu0 %v1319_v45 }
  0x84   :  { %767 = vmatprep.subr.bf16.mxu0 %v1327_v46 }
  0x87   :  { %768 = vmatpush1.bf16.msra.mxu0 %v1325_v47 }
  0x88   :  { %769 = vmatprep.subr.bf16.mxu0 %v1333_v48 }
  0x8b   :  { %770 = vmatpush1.bf16.msra.mxu0 %v1331_v49 }
  0x8c   :  { %771 = vmatprep.subr.bf16.mxu0 %v1336_v50 }
  0x8f   :  { %772 = vmatpush1.bf16.msra.mxu0 %v1334_v51 }
  0x90   :  { %773 = vmatprep.subr.bf16.mxu0 %v1342_v52 }
  0x93   :  { %774 = vmatpush1.bf16.msra.mxu0 %v1340_v53 }
  0x96   :  { %776 = vmatmul.mubr.bf16.vlgmr.msra.gmra.mrb[0].mxu0 %v54_v55 }
 0x12e   :  { %v695_v2 = vpop.f32.mrb[0].mxu1 }
 0x12f   :  { %v697_v3 = vpop.f32.mrb[1].mxu1  ;;  %v696_v17 = vadd.f32 %v695_v2, %v160_v15 }
 0x130   :  { %v699_v4 = vpop.f32.mrb[2].mxu1  ;;  %v698_v18 = vadd.f32 %v697_v3, %v164_v16 }
 0x131   :  { %v700_v5 = vpop.f32.mrb[3].mxu1 }
 0x136   :  { %v818_v6 = vpop.f32.mrb[4].mxu1 }
 0x137   :  { %v820_v7 = vpop.f32.mrb[5].mxu1 }
 0x138   :  { %v822_v8 = vpop.f32.mrb[6].mxu1 }
 0x139   :  { %v823_v9 = vpop.f32.mrb[7].mxu1 }
 0x169   :  { %v777_v19 = vpop.f32.mrb[0].mxu0 }
 0x16a   :  { %v1183_v20 = vadd.f32 %v777_v19, %v696_v17  ;;  %v779_v21 = vpop.f32.mrb[1].mxu0 }
 0x16b   :  { %v1186_v22 = vadd.f32 %v779_v21, %v698_v18  ;;  %v781_v23 = vpop.f32.mrb[2].mxu0 }
 0x16c   :  { %v1184_v24 = vadd.f32 %v1183_v20, %v818_v6  ;;  %v782_v25 = vpop.f32.mrb[3].mxu0 }
 0x16d   :  { %v1187_v26 = vadd.f32 %v1186_v22, %v820_v7 }
 0x16e   :  { %v825_v27 = vmax.f32 %v1184_v24, 0.0 }
 0x16f   :  { %v826_v28 = vmax.f32 %v1187_v26, 0.0 }
 0x170   :  { %v827_v30 = vpack.c.bf16 %v825_v27, %v825_v27 }
 0x171   :  { %v828_v29 = vpack.c.bf16 %v826_v28, %v826_v28 }
 0x173   :  { %996 = vmatprep.mubr.bf16.mxu1 %v828_v29 }
 0x174   :  { %997 = vmatmul.mubr.bf16.vlgmr.msra.gmra.mrb[8].mxu1 %v827_v30 }
 0x247   :  { %v1176_v31 = vpop.f32.mrb[8].mxu1 }
 0x248   :  { %v1177_v33 = vpop.f32.mrb[9].mxu1 }
 0x249   :  { %v1178_v34 = vadd.f32 %v1177_v33, %v1176_v31  ;;  %v1179_v35 = vpop.f32.mrb[10].mxu1 }
 0x24a   :  { %v1180_v36 = vpop.f32.mrb[11].mxu1 }
 0x24b   :  { %v999_v37 = vadd.f32 %v1178_v34, %v1141_v32 }
 0x24d   :  { %v1004_v39 = vmax.f32 %v999_v37, 0.0 }
 0x24f   :  { %v1012_v40 = vmul.f32 %v1158_v38, %v1004_v39 }
 0x251   :  { %v1014_v41 = vsel %vm1013_vm1, %v1012_v40, 0.0 }
 0x252   :  { %1015 = vadd.xlane.f32.xlu0 %v1014_v41 }
 0x2df   :  { %v1016_v43 = vpop.xlane.xlu0 %1015 }
 0x2e0   :  { %v1024_v44 = vadd.f32 %v1159_v42, %v1016_v43 }
 0x2e2   :  { %v1025_v45 = vand.u32 2147483647, %v1024_v44  ;;  %vm1032_vm3 = vcmp.ge.f32.partialorder %v1024_v44, 0.0 }
 0x2e4   :  { %v1026_v46 = vsub.f32 0.0, %v1025_v45 }
 0x2e6   :  { %v1027_v47 = vmul.f32 1.442695, %v1026_v46 }
 0x2e8   :  { %1359 = vpow2.f32 %v1027_v47 }
 0x2f2   :  { %v1360_v48 = vpop.eup %1359 }
 0x2f3   :  { %v1029_v49 = vadd.f32 1.0, %v1360_v48 }
 0x2f5   :  { %1361 = vrcp.f32 %v1029_v49 }
 0x2ff   :  { %v1362_v50 = vpop.eup %1361 }
 0x300   :  { %v1033_v51 = vsub.f32 1.0, %v1362_v50 }
 0x302   :  { %v1034_v52 = vsel %vm1032_vm3, %v1362_v50, %v1033_v51 }
 0x303   :  { %1036 = vst.msk [vmem:[%s1534_s7] sm:$0xff] %vm1035_vm2, %v1034_v52 }
 0x304   :  { %1041 = vsyncpa [#allocation4], 1 }

</bundles_post_ra>
